<compile_context>
chip_gen: v7x
topology: tpu7x:2x2x1
jax: 0.10.0
libtpu: 0.0.40
codegen_flags: <defaults>
</compile_context>

<pallas_src>
import jax
import jax.numpy as jnp
from jax.experimental import pallas as pl
from jax.experimental.pallas import tpu as pltpu


def _linreg_clamp_kernel(x_ref, w_ref, scal_ref, o_ref):
    # x_ref:    (TB, D) f32 VMEM row tile
    # w_ref:    (1, D)  f32 VMEM weight row (broadcasts over rows)
    # scal_ref: (2,)    f32 SMEM  [bias, global clamp upper bound]
    # o_ref:    (1, TB) f32 VMEM lane-dense output tile
    bias = scal_ref[0]
    upbound = scal_ref[1]

    x = x_ref[...]                                   # (TB, D)
    w = w_ref[...]                                   # (1, D)

    # Row dot-product on VPU (multiply) + XLU (lane reduce); no MXU round trip.
    y = jnp.sum(x * w, axis=1, keepdims=True) + bias  # (TB, 1) f32

    # clamp(y, 0, upbound) -- keep min-after-max order (matches torch.clamp
    # when upbound < 0).
    y = jnp.minimum(jnp.maximum(y, 0.0), upbound)

    # (TB, 1) -> (1, TB): rides the otherwise-idle XLU; store is lane-dense.
    o_ref[...] = jnp.transpose(y).astype(o_ref.dtype)


def linear_regression_forward(x, w, b, *, tb=1024):
    """x: (B, D) f32, w: (D, 1) f32, b: (1, 1)/scalar f32 -> (B, 1) f32."""
    x = x.astype(jnp.float32)
    B, D = x.shape
    w_row = jnp.reshape(w, (1, D)).astype(jnp.float32)

    # Global clamp bound + bias as SMEM scalars. NOTE: must be computed from
    # the ORIGINAL (unpadded) x -- it is a global reduction over the batch.
    upbound = jnp.max(x[:, -1])
    scalars = jnp.stack([jnp.reshape(b, ()).astype(jnp.float32), upbound])  # (2,)

    # Row tiling: small batches run as one full-extent block; large batches
    # are padded to a multiple of tb (tb % 128 == 0 keeps the x block
    # sublane-aligned and the (1, tb) output block lane-dense).
    if B <= tb:
        tb_eff, b_pad = B, B
    else:
        tb_eff = tb
        b_pad = pl.cdiv(B, tb) * tb
    if b_pad != B:
        x = jnp.pad(x, ((0, b_pad - B), (0, 0)))
    grid = (b_pad // tb_eff,)

    out_t = pl.pallas_call(
        _linreg_clamp_kernel,
        out_shape=jax.ShapeDtypeStruct((1, b_pad), jnp.float32),
        grid_spec=pltpu.PrefetchScalarGridSpec(
            num_scalar_prefetch=0,
            grid=grid,
            in_specs=[
                # x row tile; for v7x one could add pipeline_mode=pl.Buffered(3).
                pl.BlockSpec((tb_eff, D), lambda i: (i, 0)),
                # weight row, resident across the grid.
                pl.BlockSpec((1, D), lambda i: (0, 0)),
                # [bias, upbound] as SMEM scalars (no per-step VMEM DMA).
                pl.BlockSpec(memory_space=pltpu.MemorySpace.SMEM),
            ],
            out_specs=pl.BlockSpec((1, tb_eff), lambda i: (0, i)),
        ),
        compiler_params=pltpu.CompilerParams(
            dimension_semantics=("parallel",),       # shard row tiles across TCs (v7x)
            vmem_limit_bytes=32 * 1024 * 1024,       # explicit; tiles use < 1 MiB
        ),
    )(x, w_row, scalars)

    # Back to the PyTorch (B, 1) layout; drop any padding rows.
    return jnp.reshape(out_t, (b_pad, 1))[:B]


if __name__ == "__main__":
    key = jax.random.PRNGKey(0)
    k_x, k_w, k_b = jax.random.split(key, 3)

    B, D = 8, 32  # batch=8, input_size=32 (small, consistent with the module)

    # Deterministic inputs / parameters (PyTorch-like uniform init for Linear).
    x = jax.random.normal(k_x, (B, D), dtype=jnp.float32)
    bound = 1.0 / jnp.sqrt(jnp.float32(D))
    w = jax.random.uniform(k_w, (D, 1), minval=-bound, maxval=bound, dtype=jnp.float32)
    b = jax.random.uniform(k_b, (1, 1), minval=-bound, maxval=bound, dtype=jnp.float32)

    # Small-batch (single block) path.
    out = jax.block_until_ready(linear_regression_forward(x, w, b))
    ref = jnp.clip(x @ w + b[0, 0], 0.0, jnp.max(x[:, -1]))
    assert out.shape == (B, 1)
    assert jnp.allclose(out, ref, atol=1e-5, rtol=1e-5)

    # Larger batch to exercise the tiled (grid > 1, padded) path.
    B2 = 2048 + 37
    x2 = jax.random.normal(jax.random.PRNGKey(1), (B2, D), dtype=jnp.float32)
    out2 = jax.block_until_ready(linear_regression_forward(x2, w, b))
    ref2 = jnp.clip(x2 @ w + b[0, 0], 0.0, jnp.max(x2[:, -1]))
    assert out2.shape == (B2, 1)
    assert jnp.allclose(out2, ref2, atol=1e-5, rtol=1e-5)

    print("KERNEL_OK")
</pallas_src>

<mosaic_0001>
module attributes {stable_mosaic.version = 11 : i64} {
  func.func @_linreg_clamp_kernel(%arg0: i32, %arg1: memref<8x32xf32, #tpu.memory_space<vmem>>, %arg2: memref<1x32xf32, #tpu.memory_space<vmem>>, %arg3: memref<2xf32, #tpu.memory_space<smem>>, %arg4: memref<1x8xf32, #tpu.memory_space<vmem>>) attributes {dimension_semantics = [#tpu.dimension_semantics<parallel>], iteration_bounds = array<i64: 1>, scalar_prefetch = 0 : i64, scratch_operands = 0 : i64, tpu.core_type = #tpu.core_type<tc>, window_params = [{transform_indices = @transform_0, window_bounds = array<i64: 8, 32>}, {pipeline_mode = #tpu.pipeline_mode<synchronous>, transform_indices = @transform_1, window_bounds = array<i64: 1, 32>}, {transform_indices = @transform_2, window_bounds = array<i64: 2>}, {transform_indices = @transform_3, window_bounds = array<i64: 1, 8>}]} {
    %c0 = arith.constant 0 : index
    %0 = memref.load %arg3[%c0] : memref<2xf32, #tpu.memory_space<smem>>
    %c1 = arith.constant 1 : index
    %1 = memref.load %arg3[%c1] : memref<2xf32, #tpu.memory_space<smem>>
    %c0_0 = arith.constant 0 : index
    %c0_1 = arith.constant 0 : index
    %2 = vector.load %arg1[%c0_0, %c0_1] : memref<8x32xf32, #tpu.memory_space<vmem>>, vector<8x32xf32>
    %c0_2 = arith.constant 0 : index
    %c0_3 = arith.constant 0 : index
    %3 = vector.load %arg2[%c0_2, %c0_3] : memref<1x32xf32, #tpu.memory_space<vmem>>, vector<1x32xf32>
    %4 = vector.broadcast %3 : vector<1x32xf32> to vector<8x32xf32>
    %5 = arith.mulf %2, %4 : vector<8x32xf32>
    %cst = arith.constant dense<0.000000e+00> : vector<8xf32>
    %6 = vector.multi_reduction <add>, %5, %cst [1] : vector<8x32xf32> to vector<8xf32>
    %7 = vector.shape_cast %6 : vector<8xf32> to vector<8x1xf32>
    %8 = vector.broadcast %0 : f32 to vector<8x1xf32>
    %9 = arith.addf %7, %8 : vector<8x1xf32>
    %cst_4 = arith.constant 0.000000e+00 : f32
    %10 = vector.broadcast %cst_4 : f32 to vector<8x1xf32>
    %11 = arith.maximumf %9, %10 : vector<8x1xf32>
    %12 = vector.broadcast %1 : f32 to vector<8x1xf32>
    %13 = arith.minimumf %11, %12 : vector<8x1xf32>
    %14 = tpu.transpose %13, [1, 0] : vector<8x1xf32> -> vector<1x8xf32>
    %c0_5 = arith.constant 0 : index
    %c0_6 = arith.constant 0 : index
    %15 = vector.load %arg4[%c0_5, %c0_6] : memref<1x8xf32, #tpu.memory_space<vmem>>, vector<1x8xf32>
    tpu.vector_store %arg4[%c0_5, %c0_6], %14 {strides = array<i32>} : memref<1x8xf32, #tpu.memory_space<vmem>>, vector<1x8xf32>,
    return
  }
  func.func @transform_0(%arg0: i32) -> (i32, i32) {
    %c0_i32 = arith.constant 0 : i32
    %c0_i32_0 = arith.constant 0 : i32
    return %arg0, %c0_i32 : i32, i32
  }
  func.func @transform_1(%arg0: i32) -> (i32, i32) {
    %c0_i32 = arith.constant 0 : i32
    %c0_i32_0 = arith.constant 0 : i32
    %c0_i32_1 = arith.constant 0 : i32
    return %c0_i32, %c0_i32_0 : i32, i32
  }
  func.func @transform_2(%arg0: i32) -> i32 {
    %c0_i32 = arith.constant 0 : i32
    %c0_i32_0 = arith.constant 0 : i32
    return %c0_i32 : i32
  }
  func.func @transform_3(%arg0: i32) -> (i32, i32) {
    %c0_i32 = arith.constant 0 : i32
    %c0_i32_0 = arith.constant 0 : i32
    return %c0_i32, %arg0 : i32, i32
  }
}

</mosaic_0001>

<bundles_post_ra>
// kernel: tpu_custom_call.1
= control target key start
LH: loop header
LB: loop body
LE: loop exit
PB: predicated region body
PF: predicated region fallthrough
CT: control target
= control target key end

     0   :  { %8 = vsyncpa [#allocation3], 0  ;;  %s231_s0 = inlined_call_operand.hbm [shape: f32[8,32], index: 0, kind: input, shape index: {}]   ;;  %s232_s1 = inlined_call_operand.vmem [shape: f32[1,32], index: 1, kind: input, shape index: {}]   ;;  %s233_s2 = inlined_call_operand.vmem [shape: f32[2], index: 2, kind: input, shape index: {}]   ;;  %s234_s3 = inlined_call_operand.hbm [shape: f32[1,8], index: 3, kind: output, shape index: {}]  }
   0x1   :  { %9 = vsyncpa [#allocation5], 0 }
   0x2   :  { %10 = vsyncpa [#allocation4], 0  ;;  %s29_s14 = sshll.u32 %s233_s2, 4  ;;  %s178_s15 = smov [#allocation2]   ;;  %s30_s14 = int_to_ptr.vmem [resolvable:$true] %s29_s14 }
   0x3   :  { %s17_s16 = sshll.u32 %s178_s15, 4  ;;  %s116_s19 = scalar_lea.hbm %s231_s0, 128  ;;  %s18_s16 = int_to_ptr.vmem [resolvable:$true] %s17_s16 }
   0x4   :  { %p117_p0 = scmp.ne.s32.totalorder %s231_s0, %s116_s19  ;;  %p120_p1 = scmp.lt.u32.totalorder %s116_s19, %s231_s0 }
   0x6   :  { %p122_p2 = pnand %p120_p1, %p117_p0 }
   0x8   :  { %125 = shalt.err (!%p122_p2)
}
   0x9   :  { %s126_s24 = scalar_lea.vmem %s18_s16, 128  ;;  %p131_p4 = scmp.lt.s32.totalorder %s18_s16, %s18_s16 }
   0xa   :  { %p127_p3 = scmp.ne.s32.totalorder %s18_s16, %s126_s24  ;;  %p132_p5 = scmp.lt.s32.totalorder %s126_s24, %s126_s24 }
   0xc   :  { %p133_p6 = por %p132_p5, %p131_p4 }
   0xe   :  { %p134_p7 = pnand %p133_p6, %p127_p3 }
  0x10   :  { %137 = shalt.err (!%p134_p7)
}
  0x11   :  { %20 = dma.hbm_to_vmem [thread:$0]  %s231_s0, 128, %s18_s16, [#allocation3]  }
  0x12   :  { %s138_s26 = scalar_lea.vmem %s30_s14, 16  ;;  %p143_p9 = scmp.lt.s32.totalorder %s30_s14, %s30_s14 }
  0x13   :  { %p139_p8 = scmp.ne.s32.totalorder %s30_s14, %s138_s26  ;;  %p144_p10 = scmp.lt.s32.totalorder %s138_s26, %s138_s26 }
  0x15   :  { %p145_p11 = por %p144_p10, %p143_p9 }
  0x17   :  { %p146_p12 = pnand %p145_p11, %p139_p8 }
  0x19   :  { %149 = shalt.err (!%p146_p12)
}
  0x1a   :  { %s179_s27 = smov [#allocation6]  }
  0x1b   :  { %32 = dma.vmem_to_smem %s30_s14, 16, %s179_s27, [#allocation5]  }
  0x1c   :  { %172 = dma.done.wait [#allocation3], 128  }
  0x1d   :  { %173 = vsyncadd [#allocation3], 4294967168 }
  0x1e   :  { %174 = dma.done.wait [#allocation5], 16  }
  0x1f   :  { %175 = vsyncadd [#allocation5], 4294967280 }
  0x20   :  { %39 = sfence }
  0x21   :  { %v42_v0 = vld [vmem:[#allocation2] sm:$0xff]  ;;  %vm51_vm0 = vcmask 261120   ;;  %s40_s0 = sld [smem:[#allocation6]]  ;;  %s110_s30 = sld [smem:[#allocation6 + $0x1]]  ;;  %vm92_vm1 = vcmask 57344  }
  0x22   :  { %v111_v1 = vld [vmem:[%s232_s1] ss:$0 sm:$0xff]  ;;  %s180_s4 = smov [#allocation7]  }
  0x23   :  { %v50_v2 = vmul.f32 %v111_v1, %v42_v0  ;;  %s100_s5 = sshll.u32 %s180_s4, 4  ;;  %s101_s5 = int_to_ptr.vmem [resolvable:$true] %s100_s5 }
  0x24   :  { %s150_s1 = scalar_lea.vmem %s101_s5, 16  ;;  %s154_s6 = scalar_lea.vmem %s101_s5, 32 }
  0x25   :  { %v52_v3 = vsel %vm51_vm0, %v50_v2, 0.0  ;;  %p151_p13 = scmp.ne.s32.totalorder %s101_s5, %s150_s1  ;;  %p155_p0 = scmp.lt.s32.totalorder %s101_s5, %s101_s5 }
  0x26   :  { %53 = vadd.xlane.f32.xlu0 %v52_v3  ;;  %p156_p1 = scmp.lt.s32.totalorder %s154_s6, %s150_s1 }
  0x27   :  { %v55_v4 = vstv %s40_s0  ;;  %v58_v7 = vstv %s110_s30 }
  0x28   :  { %p157_p2 = por %p156_p1, %p155_p0 }
  0x2a   :  { %p158_p3 = pnand %p157_p2, %p151_p13 }
  0xb3   :  { %v54_v5 = vpop.xlane.xlu0 %53 }
  0xb4   :  { %v56_v6 = vadd.f32 %v55_v4, %v54_v5 }
  0xb6   :  { %v57_v8 = vmax.f32 %v56_v6, 0.0 }
  0xb8   :  { %v59_v9 = vmin.f32 %v57_v8, %v58_v7 }
  0xba   :  { %60 = vxpose.xlu0.b32.start.end [1/1] (short) (narrow) %v59_v9, 8 }
 0x13a   :  { %v76_v10 = vpop.trf.xlu0 }
 0x13b   :  { %93 = vst.msk [vmem:[#allocation7] sm:$0x1] %vm92_vm1, %v76_v10 }
 0x13c   :  { %161 = shalt.err (!%p158_p3)
}
 0x13d   :  { %s162_s9 = scalar_lea.hbm %s234_s3, 16 }
 0x13e   :  { %p163_p4 = scmp.ne.s32.totalorder %s234_s3, %s162_s9  ;;  %p166_p5 = scmp.lt.u32.totalorder %s162_s9, %s234_s3 }
 0x140   :  { %p168_p6 = pnand %p166_p5, %p163_p4 }
 0x142   :  { %171 = shalt.err (!%p168_p6)
}
 0x143   :  { %103 = dma.vmem_to_hbm [thread:$0]  %s101_s5, 16, %s234_s3, [#allocation4]  }
 0x144   :  { %176 = dma.done.wait [#allocation4], 16  }
 0x145   :  { %177 = vsyncadd [#allocation4], 4294967280 }
 0x146   :  { %107 = vsyncpa [#allocation3], 1 }
 0x147   :  { %108 = vsyncpa [#allocation4], 1 }
 0x148   :  { %109 = vsyncpa [#allocation5], 1 }

</bundles_post_ra>
